<compile_context>
chip_gen: v5e
topology: v5e:2x2
jax: 0.10.0
libtpu: 0.0.40
codegen_flags: <defaults>
</compile_context>

<pallas_src>
import functools

import jax
import jax.numpy as jnp
from jax.experimental import pallas as pl
from jax.experimental.pallas import tpu as pltpu


def _mlp_kernel(x_ref,
                w1_ref, b1_ref,
                w2_ref, b2_ref,
                w3_ref, b3_ref,
                w4_ref, b4_ref,
                out_ref):
    """Full 4-layer MLP on one batch tile, executed on the MXU + VPU."""
    x = x_ref[...]
    h = jnp.dot(x, w1_ref[...], preferred_element_type=jnp.float32) + b1_ref[...]
    h = jnp.maximum(h, 0.0)
    h = jnp.dot(h, w2_ref[...], preferred_element_type=jnp.float32) + b2_ref[...]
    h = jnp.maximum(h, 0.0)
    h = jnp.dot(h, w3_ref[...], preferred_element_type=jnp.float32) + b3_ref[...]
    h = jnp.maximum(h, 0.0)
    out = jnp.dot(h, w4_ref[...], preferred_element_type=jnp.float32) + b4_ref[...]
    out_ref[...] = out.astype(out_ref.dtype)


@functools.partial(jax.jit, static_argnames=("batch_tile",))
def client_dqn_forward(x, params, *, batch_tile=512):
    """Pallas forward pass. x: (B, input_dim) float32. Returns (B, output_dim)."""
    (w1, b1), (w2, b2), (w3, b3), (w4, b4) = params
    B, in_dim = x.shape
    out_dim = w4.shape[1]

    # ---- lane-dense output: zero-pad the last layer's out-features to 128 ----
    out_pad = ((out_dim + 127) // 128) * 128
    if out_pad != out_dim:
        w4p = jnp.pad(w4, ((0, 0), (0, out_pad - out_dim)))  # exact zeros
        b4p = jnp.pad(b4, (0, out_pad - out_dim))             # exact zeros
    else:
        w4p, b4p = w4, b4

    # ---- batch tiling ----
    # Small batch: one grid step covering the whole (sublane-aligned) batch.
    # Large batch: big tiles; grid has >= 2 steps so v7x megacore can split it.
    if B <= batch_tile:
        tile = ((B + 7) // 8) * 8
    else:
        tile = batch_tile
    B_pad = ((B + tile - 1) // tile) * tile
    if B_pad != B:
        x = jnp.pad(x, ((0, B_pad - B), (0, 0)))
    grid = (B_pad // tile,)

    # Biases kept 2-D so they broadcast over the batch tile inside the kernel.
    b1r, b2r, b3r = (b.reshape(1, -1) for b in (b1, b2, b3))
    b4r = b4p.reshape(1, -1)

    def rep(shape):  # weights / biases: same full block at every grid step
        return pl.BlockSpec(shape, lambda i: (0, 0))

    out = pl.pallas_call(
        _mlp_kernel,
        out_shape=jax.ShapeDtypeStruct((B_pad, out_pad), jnp.float32),
        grid_spec=pltpu.PrefetchScalarGridSpec(
            num_scalar_prefetch=0,
            grid=grid,
            in_specs=[
                pl.BlockSpec((tile, in_dim), lambda i: (i, 0)),
                rep(w1.shape), rep(b1r.shape),
                rep(w2.shape), rep(b2r.shape),
                rep(w3.shape), rep(b3r.shape),
                rep(w4p.shape), rep(b4r.shape),
            ],
            out_specs=pl.BlockSpec((tile, out_pad), lambda i: (i, 0)),
        ),
        compiler_params=pltpu.CompilerParams(
            dimension_semantics=("parallel",)),
    )(x, w1, b1r, w2, b2r, w3, b3r, w4p, b4r)

    # Drop batch padding and the zero-padded output lanes.
    return out[:B, :out_dim]


def init_params(key, input_dim=5, output_dim=54):
    """Deterministic init mirroring PyTorch nn.Linear defaults:
       W, b ~ U(-1/sqrt(fan_in), 1/sqrt(fan_in)). Weights stored (in, out)."""
    dims = [input_dim, 64, 128, 64, output_dim]
    params = []
    for fan_in, fan_out in zip(dims[:-1], dims[1:]):
        key, kw, kb = jax.random.split(key, 3)
        bound = 1.0 / (fan_in ** 0.5)
        w = jax.random.uniform(kw, (fan_in, fan_out), jnp.float32, -bound, bound)
        b = jax.random.uniform(kb, (fan_out,), jnp.float32, -bound, bound)
        params.append((w, b))
    return params


def reference_forward(x, params):
    h = x
    for i, (w, b) in enumerate(params):
        h = h @ w + b
        if i < len(params) - 1:
            h = jnp.maximum(h, 0.0)
    return h


if __name__ == "__main__":
    key = jax.random.PRNGKey(0)
    k_param, k_x, k_x2 = jax.random.split(key, 3)

    input_dim, output_dim = 5, 54
    params = init_params(k_param, input_dim, output_dim)

    # Small-batch / single-grid-step path (the typical DQN inference case).
    batch = 8
    x = jax.random.normal(k_x, (batch, input_dim), dtype=jnp.float32)
    y = client_dqn_forward(x, params)
    jax.block_until_ready(y)
    y_ref = reference_forward(x, params)
    assert y.shape == (batch, output_dim)
    assert jnp.allclose(y, y_ref, atol=1e-4, rtol=1e-4), "mismatch vs JAX reference"

    # Multi-step pipelined path (batch padding + several grid steps).
    batch2 = 200
    x2 = jax.random.normal(k_x2, (batch2, input_dim), dtype=jnp.float32)
    y2 = client_dqn_forward(x2, params, batch_tile=64)
    jax.block_until_ready(y2)
    y2_ref = reference_forward(x2, params)
    assert y2.shape == (batch2, output_dim)
    assert jnp.allclose(y2, y2_ref, atol=1e-4, rtol=1e-4), "mismatch vs JAX reference"

    print("KERNEL_OK")
</pallas_src>

<mosaic_0001>
module attributes {stable_mosaic.version = 11 : i64} {
  func.func @_mlp_kernel(%arg0: i32, %arg1: memref<8x5xf32, #tpu.memory_space<vmem>>, %arg2: memref<5x64xf32, #tpu.memory_space<vmem>>, %arg3: memref<1x64xf32, #tpu.memory_space<vmem>>, %arg4: memref<64x128xf32, #tpu.memory_space<vmem>>, %arg5: memref<1x128xf32, #tpu.memory_space<vmem>>, %arg6: memref<128x64xf32, #tpu.memory_space<vmem>>, %arg7: memref<1x64xf32, #tpu.memory_space<vmem>>, %arg8: memref<64x128xf32, #tpu.memory_space<vmem>>, %arg9: memref<1x128xf32, #tpu.memory_space<vmem>>, %arg10: memref<8x128xf32, #tpu.memory_space<vmem>>) attributes {dimension_semantics = [#tpu.dimension_semantics<parallel>], iteration_bounds = array<i64: 1>, scalar_prefetch = 0 : i64, scratch_operands = 0 : i64, tpu.core_type = #tpu.core_type<tc>, window_params = [{transform_indices = @transform_0, window_bounds = array<i64: 8, 5>}, {pipeline_mode = #tpu.pipeline_mode<synchronous>, transform_indices = @transform_1, window_bounds = array<i64: 5, 64>}, {pipeline_mode = #tpu.pipeline_mode<synchronous>, transform_indices = @transform_2, window_bounds = array<i64: 1, 64>}, {pipeline_mode = #tpu.pipeline_mode<synchronous>, transform_indices = @transform_3, window_bounds = array<i64: 64, 128>}, {pipeline_mode = #tpu.pipeline_mode<synchronous>, transform_indices = @transform_4, window_bounds = array<i64: 1, 128>}, {pipeline_mode = #tpu.pipeline_mode<synchronous>, transform_indices = @transform_5, window_bounds = array<i64: 128, 64>}, {pipeline_mode = #tpu.pipeline_mode<synchronous>, transform_indices = @transform_6, window_bounds = array<i64: 1, 64>}, {pipeline_mode = #tpu.pipeline_mode<synchronous>, transform_indices = @transform_7, window_bounds = array<i64: 64, 128>}, {pipeline_mode = #tpu.pipeline_mode<synchronous>, transform_indices = @transform_8, window_bounds = array<i64: 1, 128>}, {transform_indices = @transform_9, window_bounds = array<i64: 8, 128>}]} {
    %c0 = arith.constant 0 : index
    %c0_0 = arith.constant 0 : index
    %0 = vector.load %arg1[%c0, %c0_0] : memref<8x5xf32, #tpu.memory_space<vmem>>, vector<8x5xf32>
    %c0_1 = arith.constant 0 : index
    %c0_2 = arith.constant 0 : index
    %1 = vector.load %arg2[%c0_1, %c0_2] : memref<5x64xf32, #tpu.memory_space<vmem>>, vector<5x64xf32>
    %cst = arith.constant dense<0.000000e+00> : vector<8x64xf32>
    %2 = tpu.matmul %0, %1, %cst {dimension_numbers = #tpu.dot_dimension_numbers<[1], [0], [0], [1], [0, 0, 1, 1], [], []>} : vector<8x5xf32>, vector<5x64xf32>, vector<8x64xf32> -> vector<8x64xf32>
    %c0_3 = arith.constant 0 : index
    %c0_4 = arith.constant 0 : index
    %3 = vector.load %arg3[%c0_3, %c0_4] : memref<1x64xf32, #tpu.memory_space<vmem>>, vector<1x64xf32>
    %4 = vector.broadcast %3 : vector<1x64xf32> to vector<8x64xf32>
    %5 = arith.addf %2, %4 : vector<8x64xf32>
    %cst_5 = arith.constant 0.000000e+00 : f32
    %6 = vector.broadcast %cst_5 : f32 to vector<8x64xf32>
    %7 = arith.maximumf %5, %6 : vector<8x64xf32>
    %c0_6 = arith.constant 0 : index
    %c0_7 = arith.constant 0 : index
    %8 = vector.load %arg4[%c0_6, %c0_7] : memref<64x128xf32, #tpu.memory_space<vmem>>, vector<64x128xf32>
    %cst_8 = arith.constant dense<0.000000e+00> : vector<8x128xf32>
    %9 = tpu.matmul %7, %8, %cst_8 {dimension_numbers = #tpu.dot_dimension_numbers<[1], [0], [0], [1], [0, 0, 1, 1], [], []>} : vector<8x64xf32>, vector<64x128xf32>, vector<8x128xf32> -> vector<8x128xf32>
    %c0_9 = arith.constant 0 : index
    %c0_10 = arith.constant 0 : index
    %10 = vector.load %arg5[%c0_9, %c0_10] : memref<1x128xf32, #tpu.memory_space<vmem>>, vector<1x128xf32>
    %11 = vector.broadcast %10 : vector<1x128xf32> to vector<8x128xf32>
    %12 = arith.addf %9, %11 : vector<8x128xf32>
    %cst_11 = arith.constant 0.000000e+00 : f32
    %13 = vector.broadcast %cst_11 : f32 to vector<8x128xf32>
    %14 = arith.maximumf %12, %13 : vector<8x128xf32>
    %c0_12 = arith.constant 0 : index
    %c0_13 = arith.constant 0 : index
    %15 = vector.load %arg6[%c0_12, %c0_13] : memref<128x64xf32, #tpu.memory_space<vmem>>, vector<128x64xf32>
    %cst_14 = arith.constant dense<0.000000e+00> : vector<8x64xf32>
    %16 = tpu.matmul %14, %15, %cst_14 {dimension_numbers = #tpu.dot_dimension_numbers<[1], [0], [0], [1], [0, 0, 1, 1], [], []>} : vector<8x128xf32>, vector<128x64xf32>, vector<8x64xf32> -> vector<8x64xf32>
    %c0_15 = arith.constant 0 : index
    %c0_16 = arith.constant 0 : index
    %17 = vector.load %arg7[%c0_15, %c0_16] : memref<1x64xf32, #tpu.memory_space<vmem>>, vector<1x64xf32>
    %18 = vector.broadcast %17 : vector<1x64xf32> to vector<8x64xf32>
    %19 = arith.addf %16, %18 : vector<8x64xf32>
    %cst_17 = arith.constant 0.000000e+00 : f32
    %20 = vector.broadcast %cst_17 : f32 to vector<8x64xf32>
    %21 = arith.maximumf %19, %20 : vector<8x64xf32>
    %c0_18 = arith.constant 0 : index
    %c0_19 = arith.constant 0 : index
    %22 = vector.load %arg8[%c0_18, %c0_19] : memref<64x128xf32, #tpu.memory_space<vmem>>, vector<64x128xf32>
    %cst_20 = arith.constant dense<0.000000e+00> : vector<8x128xf32>
    %23 = tpu.matmul %21, %22, %cst_20 {dimension_numbers = #tpu.dot_dimension_numbers<[1], [0], [0], [1], [0, 0, 1, 1], [], []>} : vector<8x64xf32>, vector<64x128xf32>, vector<8x128xf32> -> vector<8x128xf32>
    %c0_21 = arith.constant 0 : index
    %c0_22 = arith.constant 0 : index
    %24 = vector.load %arg9[%c0_21, %c0_22] : memref<1x128xf32, #tpu.memory_space<vmem>>, vector<1x128xf32>
    %25 = vector.broadcast %24 : vector<1x128xf32> to vector<8x128xf32>
    %26 = arith.addf %23, %25 : vector<8x128xf32>
    %c0_23 = arith.constant 0 : index
    %c0_24 = arith.constant 0 : index
    %27 = vector.load %arg10[%c0_23, %c0_24] : memref<8x128xf32, #tpu.memory_space<vmem>>, vector<8x128xf32>
    tpu.vector_store %arg10[%c0_23, %c0_24], %26 {strides = array<i32>} : memref<8x128xf32, #tpu.memory_space<vmem>>, vector<8x128xf32>,
    return
  }
  func.func @transform_0(%arg0: i32) -> (i32, i32) {
    %c0_i32 = arith.constant 0 : i32
    %c0_i32_0 = arith.constant 0 : i32
    return %arg0, %c0_i32 : i32, i32
  }
  func.func @transform_1(%arg0: i32) -> (i32, i32) {
    %c0_i32 = arith.constant 0 : i32
    %c0_i32_0 = arith.constant 0 : i32
    %c0_i32_1 = arith.constant 0 : i32
    return %c0_i32, %c0_i32_0 : i32, i32
  }
  func.func @transform_2(%arg0: i32) -> (i32, i32) {
    %c0_i32 = arith.constant 0 : i32
    %c0_i32_0 = arith.constant 0 : i32
    %c0_i32_1 = arith.constant 0 : i32
    return %c0_i32, %c0_i32_0 : i32, i32
  }
  func.func @transform_3(%arg0: i32) -> (i32, i32) {
    %c0_i32 = arith.constant 0 : i32
    %c0_i32_0 = arith.constant 0 : i32
    %c0_i32_1 = arith.constant 0 : i32
    return %c0_i32, %c0_i32_0 : i32, i32
  }
  func.func @transform_4(%arg0: i32) -> (i32, i32) {
    %c0_i32 = arith.constant 0 : i32
    %c0_i32_0 = arith.constant 0 : i32
    %c0_i32_1 = arith.constant 0 : i32
    return %c0_i32, %c0_i32_0 : i32, i32
  }
  func.func @transform_5(%arg0: i32) -> (i32, i32) {
    %c0_i32 = arith.constant 0 : i32
    %c0_i32_0 = arith.constant 0 : i32
    %c0_i32_1 = arith.constant 0 : i32
    return %c0_i32, %c0_i32_0 : i32, i32
  }
  func.func @transform_6(%arg0: i32) -> (i32, i32) {
    %c0_i32 = arith.constant 0 : i32
    %c0_i32_0 = arith.constant 0 : i32
    %c0_i32_1 = arith.constant 0 : i32
    return %c0_i32, %c0_i32_0 : i32, i32
  }
  func.func @transform_7(%arg0: i32) -> (i32, i32) {
    %c0_i32 = arith.constant 0 : i32
    %c0_i32_0 = arith.constant 0 : i32
    %c0_i32_1 = arith.constant 0 : i32
    return %c0_i32, %c0_i32_0 : i32, i32
  }
  func.func @transform_8(%arg0: i32) -> (i32, i32) {
    %c0_i32 = arith.constant 0 : i32
    %c0_i32_0 = arith.constant 0 : i32
    %c0_i32_1 = arith.constant 0 : i32
    return %c0_i32, %c0_i32_0 : i32, i32
  }
  func.func @transform_9(%arg0: i32) -> (i32, i32) {
    %c0_i32 = arith.constant 0 : i32
    %c0_i32_0 = arith.constant 0 : i32
    return %arg0, %c0_i32 : i32, i32
  }
}

</mosaic_0001>

<bundles_post_ra>
// kernel: client_dqn_forward.1
= control target key start
LH: loop header
LB: loop body
LE: loop exit
PB: predicated region body
PF: predicated region fallthrough
CT: control target
= control target key end

     0   :  { %vm43_vm0 = vcmask 1044480   ;;  %vm39_vm1 = vcmask 39936   ;;  %s403_s0 = inlined_call_operand.vmem [shape: f32[8,5], index: 0, kind: input, shape index: {}]   ;;  %s404_s1 = inlined_call_operand.vmem [shape: f32[5,64], index: 1, kind: input, shape index: {}]   ;;  %s405_s2 = inlined_call_operand.vmem [shape: f32[1,64], index: 2, kind: input, shape index: {}]   ;;  %s406_s3 = inlined_call_operand.vmem [shape: f32[64,128], index: 3, kind: input, shape index: {}]   ;;  %s407_s4 = inlined_call_operand.vmem [shape: f32[1,128], index: 4, kind: input, shape index: {}]   ;;  %s408_s5 = inlined_call_operand.vmem [shape: f32[128,64], index: 5, kind: input, shape index: {}]   ;;  %s409_s6 = inlined_call_operand.vmem [shape: f32[1,64], index: 6, kind: input, shape index: {}]   ;;  %s410_s7 = inlined_call_operand.vmem [shape: f32[64,128], index: 7, kind: input, shape index: {}]   ;;  %s411_s8 = inlined_call_operand.vmem [shape: f32[1,128], index: 8, kind: input, shape index: {}]   ;;  %s412_s9 = inlined_call_operand.hbm [shape: f32[8,128], index: 9, kind: output, shape index: {}]  }
   0x1   :  { %v34_v0 = vld [vmem:[%s404_s1] sm:$0x1f]  ;;  %v75_v2 = vld [vmem:[%s406_s3 + $0x38] sm:$0xff]  ;;  %v74_v3 = vld [vmem:[%s406_s3 + $0x30] sm:$0xff] }
   0x2   :  { %v33_v1 = vld [vmem:[%s403_s0] sm:$0xff]  ;;  %198 = vmatpush.msk.msra.mxu0 %vm43_vm0, %v34_v0  ;;  %92 = vmatpush.msra.mxu1 %v75_v2  ;;  %v73_v4 = vld [vmem:[%s406_s3 + $0x28] sm:$0xff] }
   0x3   :  { %199 = vmatmul.msk.f32.vlgmr.msra.gmra.mxu0 %vm39_vm1, %v33_v1  ;;  %v72_v5 = vld [vmem:[%s406_s3 + $0x20] sm:$0xff] }
   0x4   :  { %93 = vmatpush.msra.mxu1 %v74_v3 }
   0x5   :  { %14 = vsyncpa [#allocation3], 0  ;;  %v71_v6 = vld [vmem:[%s406_s3 + $0x18] sm:$0xff]  ;;  %v70_v7 = vld [vmem:[%s406_s3 + $0x10] sm:$0xff]  ;;  %vm80_vm2 = vcmask 523264   ;;  %s233_s11 = smov [#allocation2]  }
   0x6   :  { %94 = vmatpush.msra.mxu1 %v73_v4  ;;  %v69_v8 = vld [vmem:[%s406_s3 + $0x8] sm:$0xff]  ;;  %v68_v9 = vld [vmem:[%s406_s3] sm:$0xff]  ;;  %v120_v10 = vld [vmem:[%s408_s5 + $0x78] sm:$0xff]  ;;  %s187_s12 = sshll.u32 %s233_s11, 4  ;;  %s188_s12 = int_to_ptr.vmem [resolvable:$true] %s187_s12 }
   0x7   :  { %v119_v11 = vld [vmem:[%s408_s5 + $0x70] sm:$0xff]  ;;  %125 = vmatpush.msra.mxu2 %v120_v10  ;;  %v118_v12 = vld [vmem:[%s408_s5 + $0x68] sm:$0xff]  ;;  %v117_v13 = vld [vmem:[%s408_s5 + $0x60] sm:$0xff] }
   0x8   :  { %95 = vmatpush.msra.mxu1 %v72_v5  ;;  %v116_v14 = vld [vmem:[%s408_s5 + $0x58] sm:$0xff]  ;;  %v115_v15 = vld [vmem:[%s408_s5 + $0x50] sm:$0xff]  ;;  %v114_v16 = vld [vmem:[%s408_s5 + $0x48] sm:$0xff] }
   0x9   :  { %126 = vmatpush.msra.mxu2 %v119_v11  ;;  %v113_v17 = vld [vmem:[%s408_s5 + $0x40] sm:$0xff]  ;;  %v112_v18 = vld [vmem:[%s408_s5 + $0x38] sm:$0xff]  ;;  %v111_v19 = vld [vmem:[%s408_s5 + $0x30] sm:$0xff] }
   0xa   :  { %96 = vmatpush.msra.mxu1 %v71_v6  ;;  %v110_v20 = vld [vmem:[%s408_s5 + $0x28] sm:$0xff]  ;;  %v109_v21 = vld [vmem:[%s408_s5 + $0x20] sm:$0xff]  ;;  %v108_v22 = vld [vmem:[%s408_s5 + $0x18] sm:$0xff] }
   0xb   :  { %127 = vmatpush.msra.mxu2 %v118_v12  ;;  %v203_v23 = vld [vmem:[%s405_s2] ss:$0 sm:$0xff]  ;;  %v107_v27 = vld [vmem:[%s408_s5 + $0x10] sm:$0xff]  ;;  %v106_v28 = vld [vmem:[%s408_s5 + $0x8] sm:$0xff] }
   0xc   :  { %97 = vmatpush.msra.mxu1 %v70_v7  ;;  %v105_v29 = vld [vmem:[%s408_s5] sm:$0xff]  ;;  %v153_v30 = vld [vmem:[%s410_s7 + $0x38] sm:$0xff]  ;;  %v152_v31 = vld [vmem:[%s410_s7 + $0x30] sm:$0xff] }
   0xd   :  { %128 = vmatpush.msra.mxu2 %v117_v13  ;;  %169 = vmatpush.msra.mxu3 %v153_v30  ;;  %v151_v32 = vld [vmem:[%s410_s7 + $0x28] sm:$0xff]  ;;  %v150_v33 = vld [vmem:[%s410_s7 + $0x20] sm:$0xff]  ;;  %v149_v34 = vld [vmem:[%s410_s7 + $0x18] sm:$0xff] }
   0xe   :  { %98 = vmatpush.msra.mxu1 %v69_v8  ;;  %v204_v35 = vld [vmem:[%s407_s4] ss:$0 sm:$0xff]  ;;  %v148_v39 = vld [vmem:[%s410_s7 + $0x10] sm:$0xff]  ;;  %v147_v40 = vld [vmem:[%s410_s7 + $0x8] sm:$0xff] }
   0xf   :  { %129 = vmatpush.msra.mxu2 %v116_v14  ;;  %170 = vmatpush.msra.mxu3 %v152_v31  ;;  %v146_v41 = vld [vmem:[%s410_s7] sm:$0xff]  ;;  %s189_s7 = sshll.u32 %s412_s9, 4  ;;  %s190_s7 = int_to_ptr.hbm [resolvable:$true] %s189_s7 }
  0x10   :  { %99 = vmatpush.msra.mxu1 %v68_v9  ;;  %v205_v42 = vld [vmem:[%s409_s6] ss:$0 sm:$0xff] }
  0x11   :  { %130 = vmatpush.msra.mxu2 %v115_v15  ;;  %171 = vmatpush.msra.mxu3 %v151_v32  ;;  %v206_v46 = vld [vmem:[%s411_s8] ss:$0 sm:$0xff] }
  0x13   :  { %131 = vmatpush.msra.mxu2 %v114_v16  ;;  %172 = vmatpush.msra.mxu3 %v150_v33 }
  0x15   :  { %132 = vmatpush.msra.mxu2 %v113_v17  ;;  %173 = vmatpush.msra.mxu3 %v149_v34 }
  0x17   :  { %133 = vmatpush.msra.mxu2 %v112_v18  ;;  %174 = vmatpush.msra.mxu3 %v148_v39 }
  0x19   :  { %134 = vmatpush.msra.mxu2 %v111_v19  ;;  %175 = vmatpush.msra.mxu3 %v147_v40 }
  0x1b   :  { %135 = vmatpush.msra.mxu2 %v110_v20  ;;  %176 = vmatpush.msra.mxu3 %v146_v41 }
  0x1d   :  { %136 = vmatpush.msra.mxu2 %v109_v21 }
  0x1f   :  { %137 = vmatpush.msra.mxu2 %v108_v22 }
  0x21   :  { %138 = vmatpush.msra.mxu2 %v107_v27 }
  0x23   :  { %139 = vmatpush.msra.mxu2 %v106_v28 }
  0x25   :  { %140 = vmatpush.msra.mxu2 %v105_v29 }
  0x80   :  { %v64_v24 = vpop.f32.mrf.mxu0 }
  0x81   :  { %v65_v25 = vadd.f32 %v203_v23, %v64_v24 }
  0x83   :  { %v67_v26 = vmax.f32 %v65_v25, 0.0 }
  0x85   :  { %200 = vmatmul.msk.f32.vlgmr.msra.gmra.mxu1 %vm80_vm2, %v67_v26 }
 0x102   :  { %v101_v36 = vpop.f32.mrf.mxu1 }
 0x103   :  { %v102_v37 = vadd.f32 %v204_v35, %v101_v36 }
 0x105   :  { %v104_v38 = vmax.f32 %v102_v37, 0.0 }
 0x107   :  { %141 = vmatmul.f32.vlgmr.msra.gmra.mxu2 %v104_v38 }
 0x18a   :  { %v142_v43 = vpop.f32.mrf.mxu2 }
 0x18b   :  { %v143_v44 = vadd.f32 %v205_v42, %v142_v43 }
 0x18d   :  { %v145_v45 = vmax.f32 %v143_v44, 0.0 }
 0x18f   :  { %201 = vmatmul.msk.f32.vlgmr.msra.gmra.mxu3 %vm80_vm2, %v145_v45 }
 0x212   :  { %v178_v47 = vpop.f32.mrf.mxu3 }
 0x213   :  { %v179_v48 = vadd.f32 %v206_v46, %v178_v47 }
 0x215   :  { %181 = vst [vmem:[#allocation2] sm:$0xff] %v179_v48 }
 0x216   :  { %192 = dma.vmem_to_hbm [thread:$0]  %s188_s12, 128, %s190_s7, [#allocation3]  }
 0x217   :  { %231 = dma.done.wait [#allocation3], 128  }
 0x218   :  { %232 = vsyncadd [#allocation3], 4294967168 }
 0x219   :  { %197 = vsyncpa [#allocation3], 1 }

</bundles_post_ra>
